<compile_context>
chip_gen: v6e
topology: v6e:2x2x1
jax: 0.10.0
libtpu: 0.0.40
codegen_flags: <defaults>
</compile_context>

<pallas_src>
import math

import jax
import jax.numpy as jnp
from jax import lax
from jax.experimental import pallas as pl
from jax.experimental.pallas import tpu as pltpu

_SUBLANE = 8
_LANE = 128


def _round_up(x, m):
    return ((x + m - 1) // m) * m


def _make_fused_conv_kernel(*, num_layers, kernel_sizes, relus, offsets, valid_lens,
                            tile_l, num_tiles, nb_block, seg_stride, compute_dtype):
    """Fused conv-chain kernel body.

    refs = (x_hbm, w_0, b_0, ..., w_{M-1}, b_{M-1}, o_ref, xbuf, sem)
      x_hbm : (Npad, Cpad_0, L_halo)  raw HBM ref (memory_space=pl.ANY)
      w_j   : (Cpad_{j+1}, k_j*Cpad_j)  folded im2col weights (compute dtype)
      b_j   : (Cpad_{j+1}, 1)           bias (f32)
      o_ref : (nb_block, Cpad_M, tile_l) lane-dense output tile
      xbuf  : (2, nb_block, Cpad_0, seg_stride) double-buffered input windows
      sem   : DMA semaphores (2,)
    """

    def kernel(*refs):
        x_hbm = refs[0]
        w_refs = [refs[1 + 2 * j] for j in range(num_layers)]
        b_refs = [refs[2 + 2 * j] for j in range(num_layers)]
        o_ref = refs[1 + 2 * num_layers]
        xbuf = refs[2 + 2 * num_layers]
        sem = refs[3 + 2 * num_layers]

        b = pl.program_id(0)          # batch-block index
        t = pl.program_id(1)          # L-tile index
        row0 = b * nb_block
        slot = t % 2

        def start_fetch(tile_idx, sl):
            src = x_hbm.at[pl.ds(row0, nb_block), :,
                           pl.ds(tile_idx * tile_l, seg_stride)]
            pltpu.make_async_copy(src, xbuf.at[sl], sem.at[sl]).start()

        # Prime the window DMA for the first tile of this batch-row.  The
        # prefetch chain is confined to one row (axis 1 is "arbitrary", i.e.
        # sequential on one core), so megacore sharding of axis 0 stays safe.
        if num_tiles == 1:
            start_fetch(0, 0)
        else:
            @pl.when(t == 0)
            def _():
                start_fetch(0, 0)

        # Wait for the current tile's window (shape-matching descriptor).
        pltpu.make_async_copy(
            x_hbm.at[pl.ds(0, nb_block), :, pl.ds(0, seg_stride)],
            xbuf.at[slot], sem.at[slot],
        ).wait()

        # Prefetch the next tile's window while we compute on this one.
        if num_tiles > 1:
            @pl.when(t + 1 < num_tiles)
            def _():
                start_fetch(t + 1, 1 - slot)

        # Fold the batch rows along the lane axis: segment i occupies lanes
        # [i*seg_stride, (i+1)*seg_stride).  Valid data per segment shrinks by
        # (k_j - 1) per layer but never crosses a segment boundary.
        xb = xbuf[slot]                               # (nb, cp0, seg) compute dtype
        parts = [xb[i] for i in range(nb_block)]
        cur = parts[0] if nb_block == 1 else jnp.concatenate(parts, axis=1)

        # Hoisted per-lane "position within segment" index, shared by every
        # layer's boundary mask (two scalar compares + one select per layer).
        base = lax.broadcasted_iota(jnp.int32, (1, seg_stride), 1)
        if nb_block > 1:
            base = jnp.concatenate([base] * nb_block, axis=1)

        t0 = t * tile_l                               # first output coord of tile

        for j in range(num_layers):
            w = w_refs[j][...]                        # (cpo, k*cpi) compute dtype
            bias = b_refs[j][...]                     # (cpo, 1) f32
            k = kernel_sizes[j]
            n_out = cur.shape[1] - (k - 1)

            # im2col-lite: k statically shifted lane windows stacked along the
            # sublane (channel) axis -> ONE MXU contraction over k * cpi.
            if k == 1:
                col = cur
            else:
                col = jnp.concatenate([cur[:, s:s + n_out] for s in range(k)],
                                      axis=0)
            y = jnp.dot(w, col, preferred_element_type=jnp.float32)
            y = y + bias
            if relus[j]:
                y = jnp.maximum(y, 0.0)

            if j < num_layers - 1:
                # Emulate the NEXT conv's zero padding: positions outside this
                # level's valid range must read back as exact zeros.
                off = t0 + offsets[j + 1]
                p = base[:, :n_out]
                y = jnp.where((p >= -off) & (p < valid_lens[j + 1] - off), y, 0.0)
                cur = y.astype(compute_dtype)
            else:
                # Lane-aligned per-segment store (seg_stride is a multiple of 128).
                for i in range(nb_block):
                    o_ref[i, :, :] = y[:, i * seg_stride:
                                       i * seg_stride + tile_l].astype(o_ref.dtype)

    return kernel


class CellModulePallas:
    """Pallas equivalent of CellModule for a chain of Conv1d(+ReLU) layers.

    layer_params: list of dicts {"w": (C_out, C_in, K), "b": (C_out,),
                                 "padding": int, "relu": bool}
    Only stride=1 / dilation=1 Conv1d layers are supported.
    # TODO(synk): arbitrary layer_list contents / activation_fn (non-Conv1d,
    # non-ReLU modules, strided/dilated convs) are not translated.
    """

    def __init__(self, layer_params, tile_l=1024, batch_block=8,
                 compute_dtype=jnp.bfloat16):
        for p in layer_params:
            assert int(p.get("stride", 1)) == 1 and int(p.get("dilation", 1)) == 1, \
                "only stride=1 / dilation=1 Conv1d layers are supported"
        self.layer_params = layer_params
        self.tile_l = int(tile_l)
        self.batch_block = int(batch_block)
        self.compute_dtype = compute_dtype

        self.kernel_sizes = [int(p["w"].shape[2]) for p in layer_params]
        self.paddings = [int(p["padding"]) for p in layer_params]
        self.relus = [bool(p["relu"]) for p in layer_params]
        # channels per "level": level 0 = input, level j = output of layer j-1
        self.channels = [int(layer_params[0]["w"].shape[1])] + \
                        [int(p["w"].shape[0]) for p in layer_params]
        self.channels_pad = [_round_up(c, _SUBLANE) for c in self.channels]

        # Hoisted once (not per forward): fold taps into (Cpad_out, K*Cpad_in),
        # pad channels to sublane multiples, pre-cast to the compute dtype, and
        # reshape the bias to (Cpad_out, 1) f32.
        self.w_folded = []
        self.b_folded = []
        for j, p in enumerate(layer_params):
            c_out, c_in, k = p["w"].shape
            cpi, cpo = self.channels_pad[j], self.channels_pad[j + 1]
            w_p = jnp.zeros((cpo, cpi, k), jnp.float32)
            w_p = w_p.at[:c_out, :c_in, :].set(jnp.asarray(p["w"], jnp.float32))
            # row order of the folded contraction dim = (tap s major, channel minor)
            w_f = jnp.transpose(w_p, (0, 2, 1)).reshape(cpo, k * cpi)
            self.w_folded.append(w_f.astype(compute_dtype))
            b_p = jnp.zeros((cpo, 1), jnp.float32)
            b_p = b_p.at[:c_out, 0].set(jnp.asarray(p["b"], jnp.float32))
            self.b_folded.append(b_p)

    @property
    def out_channels(self):
        return self.channels[-1]

    def out_seq_len(self, seq_len):
        for k, p in zip(self.kernel_sizes, self.paddings):
            seq_len = seq_len + 2 * p + 1 - ((k - 1) + 1)
        return seq_len

    # ------------------------------------------------------------------ call
    def __call__(self, x_ncl):
        n, c_in, seq_len = x_ncl.shape
        assert c_in == self.channels[0], "input channel mismatch"
        m = len(self.layer_params)

        # Valid length of every level (level 0 = input).
        valid_lens = [seq_len]
        for k, p in zip(self.kernel_sizes, self.paddings):
            valid_lens.append(valid_lens[-1] + 2 * p - k + 1)
        l_out = valid_lens[-1]
        assert l_out > 0, "sequence too short for this conv stack"

        halo = sum(k - 1 for k in self.kernel_sizes)
        cp0, cpm = self.channels_pad[0], self.channels_pad[-1]
        cbytes = jnp.dtype(self.compute_dtype).itemsize
        obytes = jnp.dtype(x_ncl.dtype).itemsize

        def plan(tile_l_req, nb_req):
            if l_out <= tile_l_req:
                tl, nt = l_out, 1
            else:
                tl = max(_LANE, (tile_l_req // _LANE) * _LANE)
                nt = pl.cdiv(l_out, tl)
            nb = max(1, min(nb_req, n))
            # keep >= 2 grid steps for v7x's two TensorCores when possible
            if nt == 1 and n >= 2 and nb >= n:
                nb = (n + 1) // 2
            seg = _round_up(tl + halo, _LANE)           # lane stride per batch row
            lanes = nb * seg
            est = 2 * nb * cp0 * seg * cbytes           # input window double buffer
            est += 2 * nb * cpm * tl * obytes           # output double buffer
            act = 0
            for j in range(m):
                kj = self.kernel_sizes[j]
                cpi, cpo = self.channels_pad[j], self.channels_pad[j + 1]
                act = max(act, lanes * (kj * cpi * cbytes + cpi * cbytes + cpo * 4))
            est += 2 * act                              # live per-layer intermediates
            est += 2 * sum(int(w.size) * w.dtype.itemsize + int(b.size) * 4
                           for w, b in zip(self.w_folded, self.b_folded))
            return tl, nt, nb, seg, est

        tile_l_req, nb_req = self.tile_l, self.batch_block
        tile_l, num_tiles, nb_block, seg, est = plan(tile_l_req, nb_req)
        budget = 40 * 1024 * 1024
        while est > budget and nb_block > 1:            # first shrink batch folding
            nb_req = max(1, nb_block // 2)
            tile_l, num_tiles, nb_block, seg, est = plan(tile_l_req, nb_req)
        while est > budget and tile_l_req > _LANE:      # then shrink L tiles
            tile_l_req = max(_LANE, tile_l_req // 2)
            tile_l, num_tiles, nb_block, seg, est = plan(tile_l_req, nb_req)

        n_blocks = pl.cdiv(n, nb_block)
        n_pad = n_blocks * nb_block

        # Halo bookkeeping (stride=1/dilation=1): offsets[j] = start of the
        # level-j window (relative to the output tile start) in valid coords.
        offsets = [0] * (m + 1)
        for j in range(m - 1, -1, -1):
            offsets[j] = offsets[j + 1] - self.paddings[j]
        pad_left = -offsets[0]
        needed_len = (num_tiles - 1) * tile_l + seg
        pad_right = max(0, needed_len - pad_left - seq_len)

        # One small halo + alignment zero-pad (intermediate layer padding is
        # handled in-kernel via masking) fused with the cast to compute dtype.
        x_pad = jnp.pad(
            x_ncl, ((0, n_pad - n), (0, cp0 - c_in), (pad_left, pad_right))
        ).astype(self.compute_dtype)

        kernel = _make_fused_conv_kernel(
            num_layers=m,
            kernel_sizes=tuple(self.kernel_sizes),
            relus=tuple(self.relus),
            offsets=tuple(offsets),
            valid_lens=tuple(valid_lens),
            tile_l=tile_l,
            num_tiles=num_tiles,
            nb_block=nb_block,
            seg_stride=seg,
            compute_dtype=self.compute_dtype,
        )

        in_specs = [pl.BlockSpec(memory_space=pl.ANY)]   # raw HBM ref, manual DMA
        args = [x_pad]
        for w_f, b_f in zip(self.w_folded, self.b_folded):
            in_specs.append(pl.BlockSpec(w_f.shape, lambda nb_i, ti: (0, 0)))
            in_specs.append(pl.BlockSpec(b_f.shape, lambda nb_i, ti: (0, 0)))
            args.extend([w_f, b_f])

        out = pl.pallas_call(
            kernel,
            out_shape=jax.ShapeDtypeStruct((n_pad, cpm, num_tiles * tile_l),
                                           x_ncl.dtype),
            grid=(n_blocks, num_tiles),
            in_specs=in_specs,
            out_specs=pl.BlockSpec((nb_block, cpm, tile_l),
                                   lambda nb_i, ti: (nb_i, 0, ti)),
            scratch_shapes=[
                pltpu.VMEM((2, nb_block, cp0, seg), self.compute_dtype),
                pltpu.SemaphoreType.DMA((2,)),
            ],
            compiler_params=pltpu.CompilerParams(
                dimension_semantics=("parallel", "arbitrary"),
                vmem_limit_bytes=int(min(48 * 2**20, max(32 * 2**20, 2 * est))),
            ),
        )(*args)

        # Skip the trim copy entirely when the kernel output is already exact.
        if n_pad == n and cpm == self.channels[-1] and num_tiles * tile_l == l_out:
            return out
        return out[:n, : self.channels[-1], :l_out]


# --------------------------------------------------------------------------- utils
def _torch_like_conv_init(key, c_out, c_in, k):
    # Deterministic stand-in for PyTorch's default Conv1d init (uniform bound).
    bound = 1.0 / math.sqrt(c_in * k)
    kw, kb = jax.random.split(key)
    w = jax.random.uniform(kw, (c_out, c_in, k), jnp.float32, -bound, bound)
    b = jax.random.uniform(kb, (c_out,), jnp.float32, -bound, bound)
    return w, b


def _reference_forward(x_ncl, layer_params, quantize_dtype=None):
    # Pure-JAX reference (lax conv, full f32 math).  With quantize_dtype set,
    # weights/activations are rounded to that dtype before every conv, mirroring
    # the kernel's bf16-operand / f32-accumulate MXU path exactly.
    y = x_ncl.astype(jnp.float32)
    for p in layer_params:
        w = jnp.asarray(p["w"], jnp.float32)
        if quantize_dtype is not None:
            w = w.astype(quantize_dtype).astype(jnp.float32)
            y = y.astype(quantize_dtype).astype(jnp.float32)
        y = lax.conv_general_dilated(
            y, w, window_strides=(1,),
            padding=[(p["padding"], p["padding"])],
            dimension_numbers=("NCH", "OIH", "NCH"),
            precision=lax.Precision.HIGHEST,
        ) + jnp.asarray(p["b"], jnp.float32)[None, :, None]
        if p["relu"]:
            y = jnp.maximum(y, 0.0)
    return y


if __name__ == "__main__":
    key = jax.random.PRNGKey(0)
    k_x, k_l1, k_l2, k_x2 = jax.random.split(key, 4)

    # Canonical CellModule config: Conv1d(4->8,k=3,p=1)+ReLU, Conv1d(8->8,k=3,p=1)+ReLU.
    N, C_IN, L, HIDDEN, K = 2, 4, 16, 8, 3
    w1, b1 = _torch_like_conv_init(k_l1, HIDDEN, C_IN, K)
    w2, b2 = _torch_like_conv_init(k_l2, HIDDEN, HIDDEN, K)
    layer_params = [
        {"w": w1, "b": b1, "padding": 1, "relu": True},
        {"w": w2, "b": b2, "padding": 1, "relu": True},
    ]

    # ---- Test 1: small canonical shapes (single tile, per-row grid) ---------
    x = jax.random.normal(k_x, (N, C_IN, L), jnp.float32)
    cell = CellModulePallas(layer_params)                     # bf16 MXU path
    out = jax.block_until_ready(cell(x))
    assert out.shape == (N, cell.out_channels, cell.out_seq_len(L)), out.shape

    ref_q = _reference_forward(x, layer_params, quantize_dtype=jnp.bfloat16)
    err_q = float(jnp.max(jnp.abs(out - ref_q)))
    assert jnp.allclose(out, ref_q, atol=2e-3, rtol=2e-3), err_q
    ref_f32 = _reference_forward(x, layer_params)
    assert float(jnp.max(jnp.abs(out - ref_f32))) < 1.5e-1    # bf16-compute tolerance

    # ---- Test 2: multi-tile + batch-folded + halo-window + trim paths -------
    N2, L2 = 3, 2600
    x2 = jax.random.normal(k_x2, (N2, C_IN, L2), jnp.float32)
    cell2 = CellModulePallas(layer_params, tile_l=1024)
    out2 = jax.block_until_ready(cell2(x2))
    assert out2.shape == (N2, cell2.out_channels, cell2.out_seq_len(L2)), out2.shape

    ref2_q = _reference_forward(x2, layer_params, quantize_dtype=jnp.bfloat16)
    err2_q = float(jnp.max(jnp.abs(out2 - ref2_q)))
    assert jnp.allclose(out2, ref2_q, atol=2e-3, rtol=2e-3), err2_q
    ref2_f32 = _reference_forward(x2, layer_params)
    assert float(jnp.max(jnp.abs(out2 - ref2_f32))) < 1.5e-1

    print("KERNEL_OK")
</pallas_src>

<mosaic_0001>
module attributes {stable_mosaic.version = 11 : i64} {
  func.func @kernel(%arg0: i32, %arg1: i32, %arg2: memref<2x8x128xbf16, #tpu.memory_space<any>>, %arg3: memref<8x24xbf16, #tpu.memory_space<vmem>>, %arg4: memref<8x1xf32, #tpu.memory_space<vmem>>, %arg5: memref<8x24xbf16, #tpu.memory_space<vmem>>, %arg6: memref<8x1xf32, #tpu.memory_space<vmem>>, %arg7: memref<1x8x16xf32, #tpu.memory_space<vmem>>, %arg8: memref<2x1x8x128xbf16, #tpu.memory_space<vmem>>, %arg9: memref<2x!tpu.dma_semaphore, #tpu.memory_space<semaphore_mem>>) attributes {dimension_semantics = [#tpu.dimension_semantics<parallel>, #tpu.dimension_semantics<arbitrary>], iteration_bounds = array<i64: 2, 1>, scalar_prefetch = 0 : i64, scratch_operands = 2 : i64, tpu.core_type = #tpu.core_type<tc>, window_params = [{}, {pipeline_mode = #tpu.pipeline_mode<synchronous>, transform_indices = @transform_1, window_bounds = array<i64: 8, 24>}, {pipeline_mode = #tpu.pipeline_mode<synchronous>, transform_indices = @transform_2, window_bounds = array<i64: 8, 1>}, {pipeline_mode = #tpu.pipeline_mode<synchronous>, transform_indices = @transform_3, window_bounds = array<i64: 8, 24>}, {pipeline_mode = #tpu.pipeline_mode<synchronous>, transform_indices = @transform_4, window_bounds = array<i64: 8, 1>}, {transform_indices = @transform_5, window_bounds = array<i64: 1, 8, 16>}]} {
    %c1_i32 = arith.constant 1 : i32
    %0 = arith.muli %arg0, %c1_i32 : i32
    %c2_i32 = arith.constant 2 : i32
    %c0_i32 = arith.constant 0 : i32
    %1 = arith.cmpi eq, %c2_i32, %c0_i32 : i32
    %c1_i32_0 = arith.constant 1 : i32
    %2 = arith.select %1, %c1_i32_0, %c2_i32 : i32
    %3 = arith.remsi %arg1, %2 : i32
    %c0_i32_1 = arith.constant 0 : i32
    %4 = arith.cmpi ne, %3, %c0_i32_1 : i32
    %c0_i32_2 = arith.constant 0 : i32
    %5 = arith.cmpi slt, %3, %c0_i32_2 : i32
    %c0_i32_3 = arith.constant 0 : i32
    %6 = arith.cmpi slt, %2, %c0_i32_3 : i32
    %7 = arith.xori %5, %6 : i1
    %8 = arith.andi %7, %4 : i1
    %9 = arith.addi %3, %2 : i32
    %10 = arith.select %8, %9, %3 : i32
    %c0_i32_4 = arith.constant 0 : i32
    %c0_i32_5 = arith.constant 0 : i32
    %c0_i32_6 = arith.constant 0 : i32
    %c0_i32_7 = arith.constant 0 : i32
    %11 = tpu.memref_slice %arg2[%0, %c0_i32_6, %c0_i32_7] : memref<2x8x128xbf16, #tpu.memory_space<any>> -> memref<1x8x128xbf16, #tpu.memory_space<any>>
    %c0_i32_8 = arith.constant 0 : i32
    %c0_i32_9 = arith.constant 0 : i32
    %c0_i32_10 = arith.constant 0 : i32
    %12 = tpu.memref_slice %arg8[%c0_i32_4, %c0_i32_8, %c0_i32_9, %c0_i32_10] : memref<2x1x8x128xbf16, #tpu.memory_space<vmem>> -> memref<1x1x8x128xbf16, #tpu.memory_space<vmem>>
    %13 = tpu.memref_squeeze %12 : memref<1x1x8x128xbf16, #tpu.memory_space<vmem>> -> memref<1x8x128xbf16, #tpu.memory_space<vmem>>
    %14 = tpu.memref_slice %arg9[%c0_i32_5] : memref<2x!tpu.dma_semaphore, #tpu.memory_space<semaphore_mem>> -> memref<1x!tpu.dma_semaphore, #tpu.memory_space<semaphore_mem>>
    %15 = tpu.memref_squeeze %14 : memref<1x!tpu.dma_semaphore, #tpu.memory_space<semaphore_mem>> -> memref<!tpu.dma_semaphore, #tpu.memory_space<semaphore_mem>>
    tpu.enqueue_dma source(%11 : memref<1x8x128xbf16, #tpu.memory_space<any>>) target(%13 : memref<1x8x128xbf16, #tpu.memory_space<vmem>>) target_semaphore(%15 : memref<!tpu.dma_semaphore, #tpu.memory_space<semaphore_mem>>)
    %c0_i32_11 = arith.constant 0 : i32
    %c0_i32_12 = arith.constant 0 : i32
    %c0_i32_13 = arith.constant 0 : i32
    %16 = tpu.memref_slice %arg2[%c0_i32_11, %c0_i32_12, %c0_i32_13] : memref<2x8x128xbf16, #tpu.memory_space<any>> -> memref<1x8x128xbf16, #tpu.memory_space<any>>
    %c0_i32_14 = arith.constant 0 : i32
    %c0_i32_15 = arith.constant 0 : i32
    %c0_i32_16 = arith.constant 0 : i32
    %17 = tpu.memref_slice %arg8[%10, %c0_i32_14, %c0_i32_15, %c0_i32_16] : memref<2x1x8x128xbf16, #tpu.memory_space<vmem>> -> memref<1x1x8x128xbf16, #tpu.memory_space<vmem>>
    %18 = tpu.memref_squeeze %17 : memref<1x1x8x128xbf16, #tpu.memory_space<vmem>> -> memref<1x8x128xbf16, #tpu.memory_space<vmem>>
    %19 = tpu.memref_slice %arg9[%10] : memref<2x!tpu.dma_semaphore, #tpu.memory_space<semaphore_mem>> -> memref<1x!tpu.dma_semaphore, #tpu.memory_space<semaphore_mem>>
    %20 = tpu.memref_squeeze %19 : memref<1x!tpu.dma_semaphore, #tpu.memory_space<semaphore_mem>> -> memref<!tpu.dma_semaphore, #tpu.memory_space<semaphore_mem>>
    tpu.wait_dma2 semaphore(%20 : memref<!tpu.dma_semaphore, #tpu.memory_space<semaphore_mem>>) src(%16 : memref<1x8x128xbf16, #tpu.memory_space<any>>) dst(%18 : memref<1x8x128xbf16, #tpu.memory_space<vmem>>)
    %21 = arith.index_cast %10 : i32 to index
    %c0 = arith.constant 0 : index
    %c0_17 = arith.constant 0 : index
    %c0_18 = arith.constant 0 : index
    %22 = vector.load %arg8[%21, %c0, %c0_17, %c0_18] : memref<2x1x8x128xbf16, #tpu.memory_space<vmem>>, vector<1x1x8x128xbf16>
    %23 = vector.shape_cast %22 : vector<1x1x8x128xbf16> to vector<1x8x128xbf16>
    %24 = vector.shape_cast %23 : vector<1x8x128xbf16> to vector<8x128xbf16>
    %25 = tpu.iota {dimensions = array<i32: 1>} : vector<1x128xi32>
    %c16_i32 = arith.constant 16 : i32
    %26 = arith.muli %arg1, %c16_i32 : i32
    %c0_19 = arith.constant 0 : index
    %c0_20 = arith.constant 0 : index
    %27 = vector.load %arg3[%c0_19, %c0_20] : memref<8x24xbf16, #tpu.memory_space<vmem>>, vector<8x24xbf16>
    %c0_21 = arith.constant 0 : index
    %c0_22 = arith.constant 0 : index
    %28 = vector.load %arg4[%c0_21, %c0_22] : memref<8x1xf32, #tpu.memory_space<vmem>>, vector<8x1xf32>
    %29 = vector.extract_strided_slice %24 {offsets = [0, 0], sizes = [8, 126], strides = [1, 1]} : vector<8x128xbf16> to vector<8x126xbf16>
    %30 = vector.extract_strided_slice %24 {offsets = [0, 1], sizes = [8, 126], strides = [1, 1]} : vector<8x128xbf16> to vector<8x126xbf16>
    %31 = vector.extract_strided_slice %24 {offsets = [0, 2], sizes = [8, 126], strides = [1, 1]} : vector<8x128xbf16> to vector<8x126xbf16>
    %32 = tpu.concatenate %29, %30, %31 in 0 : vector<8x126xbf16>, vector<8x126xbf16>, vector<8x126xbf16> -> vector<24x126xbf16>
    %cst = arith.constant dense<0.000000e+00> : vector<8x126xf32>
    %33 = tpu.matmul %27, %32, %cst {dimension_numbers = #tpu.dot_dimension_numbers<[1], [0], [0], [1], [0, 0, 1, 1], [], []>} : vector<8x24xbf16>, vector<24x126xbf16>, vector<8x126xf32> -> vector<8x126xf32>
    %34 = vector.broadcast %28 : vector<8x1xf32> to vector<8x126xf32>
    %35 = arith.addf %33, %34 : vector<8x126xf32>
    %cst_23 = arith.constant 0.000000e+00 : f32
    %36 = vector.broadcast %cst_23 : f32 to vector<8x126xf32>
    %37 = arith.maximumf %35, %36 : vector<8x126xf32>
    %c-1_i32 = arith.constant -1 : i32
    %38 = arith.addi %26, %c-1_i32 : i32
    %39 = vector.extract_strided_slice %25 {offsets = [0, 0], sizes = [1, 126], strides = [1, 1]} : vector<1x128xi32> to vector<1x126xi32>
    %c0_i32_24 = arith.constant 0 : i32
    %40 = arith.subi %c0_i32_24, %38 : i32
    %41 = vector.broadcast %40 : i32 to vector<1x126xi32>
    %42 = arith.cmpi sge, %39, %41 : vector<1x126xi32>
    %c16_i32_25 = arith.constant 16 : i32
    %43 = arith.subi %c16_i32_25, %38 : i32
    %44 = vector.broadcast %43 : i32 to vector<1x126xi32>
    %45 = arith.cmpi slt, %39, %44 : vector<1x126xi32>
    %46 = arith.andi %42, %45 : vector<1x126xi1>
    %cst_26 = arith.constant 0.000000e+00 : f32
    %47 = vector.shape_cast %46 : vector<1x126xi1> to vector<1x126xi1>
    %48 = vector.broadcast %47 : vector<1x126xi1> to vector<8x126xi1>
    %49 = vector.broadcast %cst_26 : f32 to vector<8x126xf32>
    %50 = arith.select %48, %37, %49 : vector<8x126xi1>, vector<8x126xf32>
    %51 = arith.truncf %50 : vector<8x126xf32> to vector<8x126xbf16>
    %c0_27 = arith.constant 0 : index
    %c0_28 = arith.constant 0 : index
    %52 = vector.load %arg5[%c0_27, %c0_28] : memref<8x24xbf16, #tpu.memory_space<vmem>>, vector<8x24xbf16>
    %c0_29 = arith.constant 0 : index
    %c0_30 = arith.constant 0 : index
    %53 = vector.load %arg6[%c0_29, %c0_30] : memref<8x1xf32, #tpu.memory_space<vmem>>, vector<8x1xf32>
    %54 = vector.extract_strided_slice %51 {offsets = [0, 0], sizes = [8, 124], strides = [1, 1]} : vector<8x126xbf16> to vector<8x124xbf16>
    %55 = vector.extract_strided_slice %51 {offsets = [0, 1], sizes = [8, 124], strides = [1, 1]} : vector<8x126xbf16> to vector<8x124xbf16>
    %56 = vector.extract_strided_slice %51 {offsets = [0, 2], sizes = [8, 124], strides = [1, 1]} : vector<8x126xbf16> to vector<8x124xbf16>
    %57 = tpu.concatenate %54, %55, %56 in 0 : vector<8x124xbf16>, vector<8x124xbf16>, vector<8x124xbf16> -> vector<24x124xbf16>
    %cst_31 = arith.constant dense<0.000000e+00> : vector<8x124xf32>
    %58 = tpu.matmul %52, %57, %cst_31 {dimension_numbers = #tpu.dot_dimension_numbers<[1], [0], [0], [1], [0, 0, 1, 1], [], []>} : vector<8x24xbf16>, vector<24x124xbf16>, vector<8x124xf32> -> vector<8x124xf32>
    %59 = vector.broadcast %53 : vector<8x1xf32> to vector<8x124xf32>
    %60 = arith.addf %58, %59 : vector<8x124xf32>
    %cst_32 = arith.constant 0.000000e+00 : f32
    %61 = vector.broadcast %cst_32 : f32 to vector<8x124xf32>
    %62 = arith.maximumf %60, %61 : vector<8x124xf32>
    %63 = vector.extract_strided_slice %62 {offsets = [0, 0], sizes = [8, 16], strides = [1, 1]} : vector<8x124xf32> to vector<8x16xf32>
    %c0_33 = arith.constant 0 : index
    %c0_34 = arith.constant 0 : index
    %c0_35 = arith.constant 0 : index
    %64 = vector.load %arg7[%c0_33, %c0_34, %c0_35] : memref<1x8x16xf32, #tpu.memory_space<vmem>>, vector<1x8x16xf32>
    %65 = vector.shape_cast %64 : vector<1x8x16xf32> to vector<8x16xf32>
    %66 = vector.shape_cast %63 : vector<8x16xf32> to vector<1x8x16xf32>
    tpu.vector_store %arg7[%c0_33, %c0_34, %c0_35], %66 {strides = array<i32>} : memref<1x8x16xf32, #tpu.memory_space<vmem>>, vector<1x8x16xf32>,
    return
  }
  func.func @transform_1(%arg0: i32, %arg1: i32) -> (i32, i32) {
    %c0_i32 = arith.constant 0 : i32
    %c0_i32_0 = arith.constant 0 : i32
    %c0_i32_1 = arith.constant 0 : i32
    return %c0_i32, %c0_i32_0 : i32, i32
  }
  func.func @transform_2(%arg0: i32, %arg1: i32) -> (i32, i32) {
    %c0_i32 = arith.constant 0 : i32
    %c0_i32_0 = arith.constant 0 : i32
    %c0_i32_1 = arith.constant 0 : i32
    return %c0_i32, %c0_i32_0 : i32, i32
  }
  func.func @transform_3(%arg0: i32, %arg1: i32) -> (i32, i32) {
    %c0_i32 = arith.constant 0 : i32
    %c0_i32_0 = arith.constant 0 : i32
    %c0_i32_1 = arith.constant 0 : i32
    return %c0_i32, %c0_i32_0 : i32, i32
  }
  func.func @transform_4(%arg0: i32, %arg1: i32) -> (i32, i32) {
    %c0_i32 = arith.constant 0 : i32
    %c0_i32_0 = arith.constant 0 : i32
    %c0_i32_1 = arith.constant 0 : i32
    return %c0_i32, %c0_i32_0 : i32, i32
  }
  func.func @transform_5(%arg0: i32, %arg1: i32) -> (i32, i32, i32) {
    %c0_i32 = arith.constant 0 : i32
    %c0_i32_0 = arith.constant 0 : i32
    return %arg0, %c0_i32, %arg1 : i32, i32, i32
  }
}

</mosaic_0001>

<bundles_post_ra>
// kernel: tpu_custom_call.1
= control target key start
LH: loop header
LB: loop body
LE: loop exit
PB: predicated region body
PF: predicated region fallthrough
CT: control target
= control target key end

     0   :  { %10 = vsyncpa [#allocation5], 0  ;;  %s864_s0 = inlined_call_operand.vmem [shape: bf16[2,8,128], index: 0, kind: input, shape index: {}]   ;;  %s865_s1 = inlined_call_operand.vmem [shape: bf16[8,24], index: 1, kind: input, shape index: {}]   ;;  %s866_s2 = inlined_call_operand.vmem [shape: f32[8,1], index: 2, kind: input, shape index: {}]   ;;  %s867_s3 = inlined_call_operand.vmem [shape: bf16[8,24], index: 3, kind: input, shape index: {}]   ;;  %s868_s4 = inlined_call_operand.vmem [shape: f32[8,1], index: 4, kind: input, shape index: {}]   ;;  %s869_s5 = inlined_call_operand.hbm [shape: f32[2,8,16], index: 5, kind: output, shape index: {}]  }
   0x1   :  { %12 = vsyncpa [#allocation5 + $0x1], 0  ;;  %s723_s18 = smov 0   ;;  %s725_s19 = smov 0  }
   0x2   :  { %s727_s20 = smov 0   ;;  %s729_s21 = smov 0  }
   0x3   :  { %s731_s22 = smov 0   ;;  %s733_s23 = smov 0  }
   0x4 LB: > { %s507_s24 = sadd.s32 4294967295, %s685_s23   ;;  %s508_s25 = sadd.s32 4294967294, %s685_s23   ;;  %s685_s23 = sphi %s733_s23, %s18_s23   ;;  %s681_s22 = sphi %s731_s22, %s876_s22   ;;  %s677_s21 = sphi %s729_s21, %s875_s21   ;;  %s673_s20 = sphi %s727_s20, %s874_s20   ;;  %s669_s19 = sphi %s725_s19, %s873_s19   ;;  %s665_s18 = sphi %s723_s18, %s872_s18  }
   0x5   : > { %s30_s26 = sadd.s32 1, %s681_s22  ;;  %s123_s27 = sadd.s32 1, %s673_s20 }
   0x6   : > { %p32_p0 = scmp.ge.s32.totalorder %s30_s26, 2  ;;  %p133_p1 = scmp.ne.s32.totalorder %s673_s20, %s669_s19 }
   0x7   : > { %p134_p2 = scmp.eq.s32.totalorder %s507_s24, 1  ;;  %p139_p3 = scmp.ne.s32.totalorder %s669_s19, %s665_s18 }
   0x8   : > { %s878_s26 = smov (%p32_p0, %s30_s26), 0  ;;  %p140_p5 = scmp.eq.s32.totalorder %s508_s25, 1 }
   0x9   : > { %p763_p4 = por %p134_p2, %p133_p1  ;;  %s118_s29 = ssub.s32 %s681_s22, %s878_s26 }
   0xa   : > { %p510_p6 = scmp.ge.s32.totalorder %s685_s23, 1  ;;  %p121_p7 = scmp.eq.s32.totalorder %s118_s29, 0 }
   0xb   : > { %p770_p8 = por %p140_p5, %p139_p3  ;;  %p170_p9 = scmp.lt.s32.totalorder %s685_s23, 3 }
   0xc   : > { %s776_s6 = scalar_select %p121_p7, %s673_s20, %s123_s27  }
   0xd   : > { %p171_p10 = pnand %p510_p6, %p170_p9 }
   0xe   : > { %s188_s7 = sand.u32 (!%p171_p10), 1, %s669_s19   ;;  %s512_s8 = sshll.u32 (!%p171_p10), %s677_s21, 2 }
   0xf   : > { %174 = sbr.rel (%p171_p10) target bundleno = 688 (0x2b0), region = 36  ;;  %s782_s9 = sshll.u32 (!%p171_p10), %s188_s7, 3 }
  0x10   : > { %s205_s12 = scalar_lea.vmem (!%p171_p10), %s864_s0, %s512_s8  ;;  %s190_s13 = scalar_lea.vmem (!%p171_p10), [#allocation4], %s782_s9 }
  0x14   : > { %v224_v0 = vld [vmem:[%s205_s12] sm:$0xf] }
  0x15   : > { %225 = vst [vmem:[#allocation2] sm:$0xf] %v224_v0 }
  0x16   : > { %251 = vsyncadd [#allocation3], 64 }
  0x17   : > { %657 = dma.done.wait [#allocation3], 64 }
  0x18   : > { %658 = vsyncadd [#allocation3], 4294967232  ;;  %v687_v1 = vmov 0.0   ;;  %vm688_vm0 = vmmov 0   ;;  %v689_v2 = vmov 0   ;;  %v265_v4 = vld [vmem:[%s866_s2] sm:$0xff]  ;;  %v261_v11 = vlaneseq }
  0x19   : > { %528 = vmatprep.subr.bf16.mxu0 %v687_v1  ;;  %536 = vmatprep.subr.bf16.mxu1 %v687_v1  ;;  %s690_s16 = smov 126   ;;  %s691_s17 = smov 127   ;;  %vm273_vm1 = vcmask 1043456   ;;  %v264_v10 = vld [vmem:[%s865_s1] sm:$0xf]  ;;  %vm283_vm2 = vcmask 195584  }
  0x1a   : > { %532 = vmatprep.mubr.msk.bf16.mxu0 %vm688_vm0, %v687_v1  ;;  %540 = vmatprep.mubr.msk.bf16.mxu1 %vm688_vm0, %v687_v1  ;;  %v262_v12 = vand.u32 127, %v261_v11  ;;  %v343_v23 = vld [vmem:[%s868_s4] sm:$0xff]  ;;  %s517_s11 = sshll.u32 %s677_s21, 7  ;;  %s423_s12 = sshll.u32 %s190_s13, 4  ;;  %vm406_vm6 = vcmask 130048   ;;  %s816_s12 = int_to_ptr.vmem [resolvable:$true] %s423_s12 }
  0x1b   : > { %604 = vset.pattern.permute.xlu1 %v689_v2  ;;  %605 = vset.pattern.permute.xlu0 %v689_v2  ;;  %v342_v28 = vld [vmem:[%s867_s3] sm:$0xf]  ;;  %s409_s21 = scalar_lea.sflag [#allocation5], %s188_s7  ;;  %s692_s24 = smov [#allocation4]  }
  0x1c   : > { %v260_v3 = vld [vmem:[#allocation2] sm:$0xf]  ;;  %280 = vperm.xlu1 %604, %v265_v4   ;;  %vm333_vm3 = vcmp.ge.s32.totalorder %v262_v12, 1  ;;  %vm336_vm4 = vcmp.lt.s32.totalorder %v262_v12, 17  ;;  %s611_s25 = sshll.u32 %s692_s24, 4  ;;  %s612_s25 = int_to_ptr.vmem [resolvable:$false] %s611_s25 }
  0x1d   : > { %v513_v5 = vcombine.low %v260_v3, %v260_v3  ;;  %vm337_vm5 = vmand %vm333_vm3, %vm336_vm4  ;;  %s613_s27 = scalar_lea.vmem %s612_s25, 256  ;;  %p614_p0 = scmp.lt.s32.totalorder %s816_s12, %s612_s25 }
  0x1f   : > { %271 = vrot.lane.b32.xlu0 %v513_v5, %s690_s16 }
  0x23   : > { %269 = vrot.lane.b32.xlu0 %v513_v5, %s691_s17 }
  0x91   : > { %v272_v6 = vpop.permute.xlu0 %271 }
  0x92   : > { %v288_v7 = vsel %vm273_vm1, %v272_v6, 0 }
  0x93   : > { %529 = vmatpush3.bf16.msra.mxu0 %v288_v7 }
  0x94   : > { %530 = vmatprep.subr.bf16.mxu0 %v687_v1 }
  0x95   : > { %v270_v8 = vpop.permute.xlu0 %269 }
  0x96   : > { %v276_v9 = vsel %vm273_vm1, %v260_v3, %v270_v8 }
  0x97   : > { %531 = vmatpush3.bf16.msra.mxu0 %v276_v9  ;;  %v281_v13 = vpop.permute.xlu1 %280 }
  0x9a   : > { %533 = vmatmul.mubr.msk.bf16.vlgmr.msra.gmra.mxu0 %vm283_vm2, %v264_v10 }
 0x15a   : > { %v324_v14 = vpop.f32.mrf.mxu0 }
 0x15b   : > { %v325_v15 = vadd.f32 %v324_v14, %v281_v13 }
 0x15c   : > { %v534_v16 = vpop.f32.mrf.mxu0 }
 0x15d   : > { %v330_v17 = vmax.f32 %v325_v15, 0.0 }
 0x15e   : > { %v327_v18 = vpop.f32.mrf.mxu0 }
 0x15f   : > { %v340_v19 = vsel %vm337_vm5, %v330_v17, 0.0 }
 0x160   : > { %v341_v20 = vpack.c.bf16 %v340_v19, %v340_v19  ;;  %v535_v21 = vpop.f32.mrf.mxu0 }
 0x162   : > { %348 = vrot.lane.b32.xlu1 %v341_v20, %s690_s16  ;;  %v345_v22 = vrot.slane %v341_v20, 4  ;;  %s814_s16 = scalar_lea.hbm %s869_s5, %s517_s11 }
 0x164   : > { %346 = vrot.lane.b32.xlu0 %v345_v22, %s691_s17  ;;  %s607_s17 = scalar_lea.vmem %s816_s12, 128 }
 0x165   : > { %p608_p11 = scmp.ne.s32.totalorder %s816_s12, %s607_s17  ;;  %p615_p1 = scmp.lt.s32.totalorder %s613_s27, %s607_s17 }
 0x166   : > { %356 = vperm.xlu1 %604, %v343_v23  }
 0x167   : > { %p609_p12 = pnand %p608_p11, %p763_p4  ;;  %p616_p2 = por %p615_p1, %p614_p0 }
 0x169   : > { %p610_p13 = pneg %p609_p12 }
 0x16b   : > { %p617_p3 = pnand %p616_p2, %p610_p13 }
 0x1d4   : > { %v349_v24 = vpop.permute.xlu1 %348 }
 0x1d5   : > { %v363_v25 = vsel %vm273_vm1, %v349_v24, 0 }
 0x1d6   : > { %537 = vmatpush3.bf16.msra.mxu1 %v363_v25  ;;  %v347_v26 = vpop.permute.xlu0 %346 }
 0x1d7   : > { %538 = vmatprep.subr.bf16.mxu1 %v687_v1  ;;  %v352_v27 = vsel %vm273_vm1, %v341_v20, %v347_v26 }
 0x1da   : > { %539 = vmatpush3.bf16.msra.mxu1 %v352_v27 }
 0x1dd   : > { %541 = vmatmul.mubr.msk.bf16.vlgmr.msra.gmra.mxu1 %vm283_vm2, %v342_v28 }
 0x1e1   : > { %v357_v29 = vpop.permute.xlu1 %356 }
 0x29d   : > { %v399_v30 = vpop.f32.mrf.mxu1 }
 0x29e   : > { %v400_v31 = vadd.f32 %v399_v30, %v357_v29 }
 0x29f   : > { %v542_v32 = vpop.f32.mrf.mxu1 }
 0x2a0   : > { %v405_v33 = vmax.f32 %v400_v31, 0.0 }
 0x2a1   : > { %v402_v34 = vpop.f32.mrf.mxu1 }
 0x2a2   : > { %407 = vst.msk [vmem:[%s190_s13] sm:$0xff] %vm406_vm6, %v405_v33 }
 0x2a3   : > { %v543_v35 = vpop.f32.mrf.mxu1 }
 0x2a4   : > { %620 = shalt.err (!%p617_p3)
}
 0x2a5   : > { %s621_s9 = scalar_lea.hbm %s814_s16, 128  ;;  %s625_s29 = scalar_lea.hbm %s869_s5, 256 }
 0x2a6   : > { %p622_p5 = scmp.ne.s32.totalorder %s814_s16, %s621_s9  ;;  %p626_p9 = scmp.lt.s32.totalorder %s814_s16, %s869_s5 }
 0x2a7   : > { %p627_p10 = scmp.lt.s32.totalorder %s625_s29, %s621_s9 }
 0x2a8   : > { %p623_p6 = pnand %p622_p5, %p763_p4 }
 0x2a9   : > { %p628_p11 = por %p627_p10, %p626_p9 }
 0x2aa   : > { %p624_p7 = pneg %p623_p6 }
 0x2ac   : > { %p629_p12 = pnand %p628_p11, %p624_p7 }
 0x2ae   : > { %632 = shalt.err (!%p629_p12)
}
 0x2af   : > { %544 = dma.vmem_to_hbm [thread:$0]  (%p763_p4), %s816_s12, 128, %s814_s16, %s409_s21  }
 0x2b0 PF: > { %p550_p13 = scmp.ge.s32.totalorder %s685_s23, 2  ;;  %s435_s11 = sand.u32 1, %s665_s18  }
 0x2b1   : > { %s436_s14 = scalar_lea.sflag [#allocation5], %s435_s11 }
 0x2b2   : > { %p547_p0 = pnand %p550_p13, %p770_p8 }
 0x2b4   : > { %p548_p1 = pneg %p547_p0 }
 0x2b6   : > { %660 = dma.done.wait (%p548_p1), %s436_s14, 128  }
 0x2b7   : > { %662 = vsyncadd (%p548_p1), %s436_s14, 4294967168  ;;  %s18_s23 = sadd.s32 1, %s685_s23   ;;  %s872_s18 = smov %s669_s19 }
 0x2b8   : > { %p15_p2 = scmp.ge.s32.totalorder %s18_s23, 4   ;;  %s873_s19 = smov %s673_s20 }
 0x2b9   : > { %s874_s20 = smov %s776_s6  ;;  %s875_s21 = smov %s681_s22 }
 0x2ba   : > { %s876_s22 = smov %s878_s26  ;;  %17 = sbr.rel (!%p15_p2) target bundleno = 4 (0x4), region = 112 }
 0x2bf   :  { %441 = vsyncpa [#allocation5], 1 }
 0x2c0   :  { %443 = vsyncpa [#allocation5 + $0x1], 1 }
 0x2c1   :  { %444 = vsyncmov [#allocation3] }
 0x2c4   :  { %s445_s28 = vpop.sfrf %444 }
 0x2c5   :  { %p520_p4 = scmp.ne.s32.totalorder %s445_s28, 0 }
 0x2c7   :  { %449 = shalt.err (%p520_p4)  }
 0x2c8   :  { %451 = vsyncmov [#allocation3 + $0x1] }
 0x2cb   :  { %s452_s30 = vpop.sfrf %451 }
 0x2cc   :  { %p521_p8 = scmp.ne.s32.totalorder %s452_s30, 0 }
 0x2ce   :  { %456 = shalt.err (%p521_p8)  }

</bundles_post_ra>
